<compile_context>
chip_gen: v5e
topology: v5e:2x2
jax: 0.10.0
libtpu: 0.0.40
codegen_flags: <defaults>
</compile_context>

<pallas_src>
import jax
import jax.numpy as jnp
from jax.experimental import pallas as pl
from jax.experimental.pallas import tpu as pltpu


def _round_up(x, m):
    return (x + m - 1) // m * m


def _reorder_gates(w):
    """PyTorch LSTM packs gates [i, f, g, o] along the 4H axis; reorder to [i, f, o, g]
    so all sigmoid gates are contiguous (tanh gate is one trailing lane band)."""
    i, f, g, o = jnp.split(w, 4, axis=0)
    return jnp.concatenate([i, f, o, g], axis=0)


def _tpu_vmem_capacity_bytes():
    try:
        return int(pltpu.get_tpu_info().vmem_capacity_bytes)
    except Exception:
        return 64 * 1024 * 1024          # conservative default (v7x per-TensorCore)


def _pick_t_chunk(T, max_chunk=32):
    # Prefer an exact divisor of T (no padding); otherwise front-pad time to a multiple of
    # max_chunk (front zero-padded steps are exact LSTM no-ops from the zero state).
    div = max(c for c in range(1, min(T, max_chunk) + 1) if T % c == 0)
    if div >= 8 or T <= max_chunk:
        return div
    return max_chunk


def sentiment_rnn_kernel(gin_ref,      # (T_CHUNK, TILE_B, 4H) bf16  fwd pre-activations, gates [i|f|o|g]
                         whh_ref,      # (H, 4H)               bf16  forward W_hh (reordered, transposed)
                         gates_b_ref,  # (TILE_B, 4H)          f32   reverse-dir pre-activation at t=T-1
                         wfc_f_ref,    # (H, O)                bf16  fc rows multiplying h_fwd
                         wfc_b_ref,    # (H, O)                bf16  fc rows multiplying h_bwd
                         bfc_ref,      # (1, O)                f32
                         out_ref,      # (TILE_B, O)           f32
                         h_ref,        # scratch (TILE_B, H)   f32   carried across time chunks
                         c_ref):       # scratch (TILE_B, H)   f32
    t_chunk, bt, _ = gin_ref.shape
    hdim = whh_ref.shape[0]
    tc = pl.program_id(1)

    @pl.when(tc == 0)
    def _():
        h_ref[...] = jnp.zeros_like(h_ref)
        c_ref[...] = jnp.zeros_like(c_ref)

    whh = whh_ref[...]

    def sig(v):                          # sigmoid via a single EUP tanh
        return 0.5 * jnp.tanh(0.5 * v) + 0.5

    def cell(gates, c):
        # gates layout [i | f | o | g] (columns reordered in the wrapper)
        if hdim % 128 == 0:              # lane-aligned slices: one tanh pass each band
            ifo = sig(gates[:, :3 * hdim])
            g = jnp.tanh(gates[:, 3 * hdim:])
            i, f, o = ifo[:, :hdim], ifo[:, hdim:2 * hdim], ifo[:, 2 * hdim:]
        else:                            # small H: one full-vreg tanh + masked select
            lane = jax.lax.broadcasted_iota(jnp.int32, gates.shape, 1)
            is_g = lane >= 3 * hdim
            th = jnp.tanh(jnp.where(is_g, gates, 0.5 * gates))
            act = jnp.where(is_g, th, 0.5 * th + 0.5)
            i, f, o, g = (act[:, :hdim], act[:, hdim:2 * hdim],
                          act[:, 2 * hdim:3 * hdim], act[:, 3 * hdim:])
        c_new = f * c + i * g
        h_new = o * jnp.tanh(c_new)
        return h_new, c_new

    def step(t, carry):
        h, c = carry
        gates = (gin_ref[t].astype(jnp.float32)
                 + jnp.dot(h.astype(jnp.bfloat16), whh,
                           preferred_element_type=jnp.float32))
        return cell(gates, c)

    # TODO(synk): split TILE_B into two interleaved sub-chains so one chain's EUP/VPU
    #             work hides the other chain's h @ W_hh MXU latency.
    h, c = jax.lax.fori_loop(0, t_chunk, step, (h_ref[...], c_ref[...]),
                             unroll=min(t_chunk, 8))
    h_ref[...] = h
    c_ref[...] = c

    @pl.when(tc == pl.num_programs(1) - 1)
    def _():
        # Reverse direction at the last timestep: one cell step from the zero state on a
        # precomputed pre-activation (h0 @ W_hh_reverse term is identically zero).
        h_bwd, _ = cell(gates_b_ref[...], jnp.zeros((bt, hdim), jnp.float32))
        logits = (jnp.dot(h.astype(jnp.bfloat16), wfc_f_ref[...],
                          preferred_element_type=jnp.float32)
                  + jnp.dot(h_bwd.astype(jnp.bfloat16), wfc_b_ref[...],
                            preferred_element_type=jnp.float32)
                  + bfc_ref[...])
        # TODO(synk): a lane-dense (1, TILE_B) output + VPU dot would avoid masked vst's
        #             for O == 1, but the write volume here is only 4 bytes/sample.
        out_ref[...] = 0.5 * jnp.tanh(0.5 * logits) + 0.5


def init_params(key, vocab_size, embedding_dim, hidden_dim, output_dim):
    E, H, O = embedding_dim, hidden_dim, output_dim
    ks = jax.random.split(key, 12)
    s = 1.0 / float(H) ** 0.5
    sf = 1.0 / float(2 * H) ** 0.5

    def u(k, shape, scale):
        return jax.random.uniform(k, shape, jnp.float32, minval=-scale, maxval=scale)

    emb = jax.random.normal(ks[0], (vocab_size, E), jnp.float32)
    emb = emb.at[0].set(0.0)             # padding_idx=0 row is zero

    # PyTorch nn.LSTM parameter layout, gate order [i, f, g, o].
    return {
        "embedding": emb,
        "w_ih_f": u(ks[1], (4 * H, E), s), "w_hh_f": u(ks[2], (4 * H, H), s),
        "b_ih_f": u(ks[3], (4 * H,), s),   "b_hh_f": u(ks[4], (4 * H,), s),
        "w_ih_b": u(ks[5], (4 * H, E), s), "w_hh_b": u(ks[6], (4 * H, H), s),
        "b_ih_b": u(ks[7], (4 * H,), s),   "b_hh_b": u(ks[8], (4 * H,), s),
        "fc_w": u(ks[9], (O, 2 * H), sf),  "fc_b": u(ks[10], (O,), sf),
    }


@jax.jit
def sentiment_rnn_forward(tokens, params):
    # tokens: (B, T) int32
    B, T = tokens.shape
    H = params["w_hh_f"].shape[1]
    O = params["fc_w"].shape[0]
    G = 4 * H

    # ---- embedding gather, time-major (T, B, E).  Data-dependent gather left to XLA.
    # TODO(synk): could be fused into the kernel via scalar-prefetched row indices.
    x = params["embedding"][tokens.T]                        # (T, B, E) f32

    # ---- gate-reordered weights ([i,f,o,g]) and hoisted input projections (one XLA matmul).
    wih_f = _reorder_gates(params["w_ih_f"])                 # (4H, E)
    whh_f = _reorder_gates(params["w_hh_f"])                 # (4H, H)
    b_f = _reorder_gates(params["b_ih_f"] + params["b_hh_f"])
    wih_b = _reorder_gates(params["w_ih_b"])
    b_b = _reorder_gates(params["b_ih_b"] + params["b_hh_b"])
    # W_hh_reverse is never needed: the reverse output at t = T-1 starts from a zero state.

    gin = jnp.einsum("tbe,ge->tbg", x, wih_f) + b_f          # (T, B, 4H) f32
    gates_b_last = x[T - 1] @ wih_b.T + b_b                  # (B, 4H)    f32

    # ---- tiling: batch tiles (parallel) x time chunks (arbitrary, serial h/c carry).
    vmem_cap = _tpu_vmem_capacity_bytes()
    TILE_B = 256 if vmem_cap >= (96 << 20) else 128          # bigger tiles on 128-MiB parts
    B8 = _round_up(B, 8)
    while TILE_B > 8 and B8 < 2 * TILE_B:                    # >=2 tiles when B permits (v7x: 2 TCs)
        TILE_B //= 2
    B_pad = _round_up(B, TILE_B)

    T_CHUNK = _pick_t_chunk(T)
    T_pad = _round_up(T, T_CHUNK)

    gin = gin.astype(jnp.bfloat16)                           # halve DMA / VMEM of the big operand
    gin = jnp.pad(gin, ((T_pad - T, 0), (0, B_pad - B), (0, 0)))   # front pad: exact LSTM no-ops
    gates_b_last = jnp.pad(gates_b_last, ((0, B_pad - B), (0, 0)))

    whh_k = whh_f.T.astype(jnp.bfloat16)                     # (H, 4H)
    wfc_f = params["fc_w"][:, :H].T.astype(jnp.bfloat16)     # (H, O) rows for h_fwd
    wfc_b = params["fc_w"][:, H:].T.astype(jnp.bfloat16)     # (H, O) rows for h_bwd
    bfc = params["fc_b"].reshape(1, O).astype(jnp.float32)

    grid = (B_pad // TILE_B, T_pad // T_CHUNK)

    def fixed(r, c):                                         # grid-invariant weight block
        return pl.BlockSpec((r, c), lambda b, t: (0, 0))

    out = pl.pallas_call(
        sentiment_rnn_kernel,
        out_shape=jax.ShapeDtypeStruct((B_pad, O), jnp.float32),
        grid=grid,
        in_specs=[
            pl.BlockSpec((T_CHUNK, TILE_B, G), lambda b, t: (t, b, 0)),  # gin: batch+time tiled
            fixed(H, G),                                                  # forward W_hh
            pl.BlockSpec((TILE_B, G), lambda b, t: (b, 0)),               # reverse pre-activation
            fixed(H, O), fixed(H, O), fixed(1, O),                        # fc
        ],
        out_specs=pl.BlockSpec((TILE_B, O), lambda b, t: (b, 0)),
        scratch_shapes=[pltpu.VMEM((TILE_B, H), jnp.float32),             # h carry across chunks
                        pltpu.VMEM((TILE_B, H), jnp.float32)],            # c carry across chunks
        compiler_params=pltpu.CompilerParams(
            dimension_semantics=("parallel", "arbitrary"),
            vmem_limit_bytes=max(32 << 20, min(100 << 20, vmem_cap - (8 << 20))),
        ),
    )(gin, whh_k, gates_b_last, wfc_f, wfc_b, bfc)

    return jnp.squeeze(out[:B])                              # matches .squeeze()


def reference_forward(tokens, params):
    """Pure-JAX float32 reference of the PyTorch module (full bidirectional scan)."""
    x = params["embedding"][tokens]                          # (B, T, E)
    B = x.shape[0]
    H = params["w_hh_f"].shape[1]

    def run_dir(xs, w_ih, w_hh, b_ih, b_hh):
        h = jnp.zeros((B, H), jnp.float32)
        c = jnp.zeros((B, H), jnp.float32)
        hs = []
        for t in range(xs.shape[1]):
            gates = xs[:, t] @ w_ih.T + b_ih + h @ w_hh.T + b_hh
            i, f, g, o = jnp.split(gates, 4, axis=-1)
            i, f, o = jax.nn.sigmoid(i), jax.nn.sigmoid(f), jax.nn.sigmoid(o)
            g = jnp.tanh(g)
            c = f * c + i * g
            h = o * jnp.tanh(c)
            hs.append(h)
        return jnp.stack(hs, axis=1)                         # (B, T, H)

    out_f = run_dir(x, params["w_ih_f"], params["w_hh_f"],
                    params["b_ih_f"], params["b_hh_f"])
    out_r = run_dir(x[:, ::-1], params["w_ih_b"], params["w_hh_b"],
                    params["b_ih_b"], params["b_hh_b"])[:, ::-1]
    last = jnp.concatenate([out_f[:, -1], out_r[:, -1]], axis=-1)   # lstm_out[:, -1, :]
    logits = last @ params["fc_w"].T + params["fc_b"]
    return jnp.squeeze(jax.nn.sigmoid(logits))


if __name__ == "__main__":
    vocab_size, embedding_dim, hidden_dim, output_dim = 50, 16, 32, 1
    B, T = 2, 8

    key = jax.random.PRNGKey(0)
    k_tok, k_par = jax.random.split(key)
    params = init_params(k_par, vocab_size, embedding_dim, hidden_dim, output_dim)
    tokens = jax.random.randint(k_tok, (B, T), 0, vocab_size, dtype=jnp.int32)

    probs = sentiment_rnn_forward(tokens, params)
    probs = jax.block_until_ready(probs)

    ref = reference_forward(tokens, params)
    assert probs.shape == (B,)
    assert bool(jnp.all((probs >= 0.0) & (probs <= 1.0)))
    assert bool(jnp.allclose(probs, ref, atol=3e-2)), (probs, ref)
    print("KERNEL_OK")
</pallas_src>

<mosaic_0001>
module attributes {stable_mosaic.version = 11 : i64} {
  func.func @sentiment_rnn_kernel(%arg0: i32, %arg1: i32, %arg2: memref<8x8x128xbf16, #tpu.memory_space<vmem>>, %arg3: memref<32x128xbf16, #tpu.memory_space<vmem>>, %arg4: memref<8x128xf32, #tpu.memory_space<vmem>>, %arg5: memref<32x1xbf16, #tpu.memory_space<vmem>>, %arg6: memref<32x1xbf16, #tpu.memory_space<vmem>>, %arg7: memref<1x1xf32, #tpu.memory_space<vmem>>, %arg8: memref<8x1xf32, #tpu.memory_space<vmem>>, %arg9: memref<8x32xf32, #tpu.memory_space<vmem>>, %arg10: memref<8x32xf32, #tpu.memory_space<vmem>>) attributes {dimension_semantics = [#tpu.dimension_semantics<parallel>, #tpu.dimension_semantics<arbitrary>], iteration_bounds = array<i64: 1, 1>, scalar_prefetch = 0 : i64, scratch_operands = 2 : i64, tpu.core_type = #tpu.core_type<tc>, window_params = [{transform_indices = @transform_0, window_bounds = array<i64: 8, 8, 128>}, {pipeline_mode = #tpu.pipeline_mode<synchronous>, transform_indices = @transform_1, window_bounds = array<i64: 32, 128>}, {transform_indices = @transform_2, window_bounds = array<i64: 8, 128>}, {pipeline_mode = #tpu.pipeline_mode<synchronous>, transform_indices = @transform_3, window_bounds = array<i64: 32, 1>}, {pipeline_mode = #tpu.pipeline_mode<synchronous>, transform_indices = @transform_4, window_bounds = array<i64: 32, 1>}, {pipeline_mode = #tpu.pipeline_mode<synchronous>, transform_indices = @transform_5, window_bounds = array<i64: 1, 1>}, {transform_indices = @transform_6, window_bounds = array<i64: 8, 1>}]} {
    %c0_i32 = arith.constant 0 : i32
    %0 = arith.cmpi eq, %arg1, %c0_i32 : i32
    %1 = arith.extui %0 : i1 to i32
    %c0_i32_0 = arith.constant 0 : i32
    %2 = arith.cmpi ne, %1, %c0_i32_0 : i32
    scf.if %2 {
      %cst_67 = arith.constant 0.000000e+00 : f32
      %235 = vector.broadcast %cst_67 : f32 to vector<8x32xf32>
      %c0_68 = arith.constant 0 : index
      %c0_69 = arith.constant 0 : index
      %236 = vector.load %arg9[%c0_68, %c0_69] : memref<8x32xf32, #tpu.memory_space<vmem>>, vector<8x32xf32>
      tpu.vector_store %arg9[%c0_68, %c0_69], %235 {strides = array<i32>} : memref<8x32xf32, #tpu.memory_space<vmem>>, vector<8x32xf32>,
      %cst_70 = arith.constant 0.000000e+00 : f32
      %237 = vector.broadcast %cst_70 : f32 to vector<8x32xf32>
      %c0_71 = arith.constant 0 : index
      %c0_72 = arith.constant 0 : index
      %238 = vector.load %arg10[%c0_71, %c0_72] : memref<8x32xf32, #tpu.memory_space<vmem>>, vector<8x32xf32>
      tpu.vector_store %arg10[%c0_71, %c0_72], %237 {strides = array<i32>} : memref<8x32xf32, #tpu.memory_space<vmem>>, vector<8x32xf32>,
    } else {
    }
    %c0 = arith.constant 0 : index
    %c0_1 = arith.constant 0 : index
    %3 = vector.load %arg3[%c0, %c0_1] : memref<32x128xbf16, #tpu.memory_space<vmem>>, vector<32x128xbf16>
    %c0_2 = arith.constant 0 : index
    %c0_3 = arith.constant 0 : index
    %4 = vector.load %arg9[%c0_2, %c0_3] : memref<8x32xf32, #tpu.memory_space<vmem>>, vector<8x32xf32>
    %c0_4 = arith.constant 0 : index
    %c0_5 = arith.constant 0 : index
    %5 = vector.load %arg10[%c0_4, %c0_5] : memref<8x32xf32, #tpu.memory_space<vmem>>, vector<8x32xf32>
    %c0_i32_6 = arith.constant 0 : i32
    %6 = arith.index_cast %c0_i32_6 : i32 to index
    %c0_7 = arith.constant 0 : index
    %c0_8 = arith.constant 0 : index
    %7 = vector.load %arg2[%6, %c0_7, %c0_8] : memref<8x8x128xbf16, #tpu.memory_space<vmem>>, vector<1x8x128xbf16>
    %8 = vector.shape_cast %7 : vector<1x8x128xbf16> to vector<8x128xbf16>
    %9 = arith.extf %8 : vector<8x128xbf16> to vector<8x128xf32>
    %10 = arith.truncf %4 : vector<8x32xf32> to vector<8x32xbf16>
    %cst = arith.constant dense<0.000000e+00> : vector<8x128xf32>
    %11 = tpu.matmul %10, %3, %cst {dimension_numbers = #tpu.dot_dimension_numbers<[1], [0], [0], [1], [0, 0, 1, 1], [], []>} : vector<8x32xbf16>, vector<32x128xbf16>, vector<8x128xf32> -> vector<8x128xf32>
    %12 = arith.addf %9, %11 : vector<8x128xf32>
    %13 = tpu.iota {dimensions = array<i32: 1>} : vector<8x128xi32>
    %c96_i32 = arith.constant 96 : i32
    %14 = vector.broadcast %c96_i32 : i32 to vector<8x128xi32>
    %15 = arith.cmpi sge, %13, %14 : vector<8x128xi32>
    %cst_9 = arith.constant 5.000000e-01 : f32
    %16 = vector.broadcast %cst_9 : f32 to vector<8x128xf32>
    %17 = arith.mulf %16, %12 : vector<8x128xf32>
    %18 = arith.select %15, %12, %17 : vector<8x128xi1>, vector<8x128xf32>
    %19 = math.tanh %18 : vector<8x128xf32>
    %cst_10 = arith.constant 5.000000e-01 : f32
    %20 = vector.broadcast %cst_10 : f32 to vector<8x128xf32>
    %21 = arith.mulf %20, %19 : vector<8x128xf32>
    %cst_11 = arith.constant 5.000000e-01 : f32
    %22 = vector.broadcast %cst_11 : f32 to vector<8x128xf32>
    %23 = arith.addf %21, %22 : vector<8x128xf32>
    %24 = arith.select %15, %19, %23 : vector<8x128xi1>, vector<8x128xf32>
    %25 = vector.extract_strided_slice %24 {offsets = [0, 0], sizes = [8, 32], strides = [1, 1]} : vector<8x128xf32> to vector<8x32xf32>
    %26 = vector.extract_strided_slice %24 {offsets = [0, 32], sizes = [8, 32], strides = [1, 1]} : vector<8x128xf32> to vector<8x32xf32>
    %27 = vector.extract_strided_slice %24 {offsets = [0, 64], sizes = [8, 32], strides = [1, 1]} : vector<8x128xf32> to vector<8x32xf32>
    %28 = vector.extract_strided_slice %24 {offsets = [0, 96], sizes = [8, 32], strides = [1, 1]} : vector<8x128xf32> to vector<8x32xf32>
    %29 = arith.mulf %26, %5 : vector<8x32xf32>
    %30 = arith.mulf %25, %28 : vector<8x32xf32>
    %31 = arith.addf %29, %30 : vector<8x32xf32>
    %32 = math.tanh %31 : vector<8x32xf32>
    %33 = arith.mulf %27, %32 : vector<8x32xf32>
    %c1_i32 = arith.constant 1 : i32
    %34 = arith.index_cast %c1_i32 : i32 to index
    %c0_12 = arith.constant 0 : index
    %c0_13 = arith.constant 0 : index
    %35 = vector.load %arg2[%34, %c0_12, %c0_13] : memref<8x8x128xbf16, #tpu.memory_space<vmem>>, vector<1x8x128xbf16>
    %36 = vector.shape_cast %35 : vector<1x8x128xbf16> to vector<8x128xbf16>
    %37 = arith.extf %36 : vector<8x128xbf16> to vector<8x128xf32>
    %38 = arith.truncf %33 : vector<8x32xf32> to vector<8x32xbf16>
    %cst_14 = arith.constant dense<0.000000e+00> : vector<8x128xf32>
    %39 = tpu.matmul %38, %3, %cst_14 {dimension_numbers = #tpu.dot_dimension_numbers<[1], [0], [0], [1], [0, 0, 1, 1], [], []>} : vector<8x32xbf16>, vector<32x128xbf16>, vector<8x128xf32> -> vector<8x128xf32>
    %40 = arith.addf %37, %39 : vector<8x128xf32>
    %41 = tpu.iota {dimensions = array<i32: 1>} : vector<8x128xi32>
    %c96_i32_15 = arith.constant 96 : i32
    %42 = vector.broadcast %c96_i32_15 : i32 to vector<8x128xi32>
    %43 = arith.cmpi sge, %41, %42 : vector<8x128xi32>
    %cst_16 = arith.constant 5.000000e-01 : f32
    %44 = vector.broadcast %cst_16 : f32 to vector<8x128xf32>
    %45 = arith.mulf %44, %40 : vector<8x128xf32>
    %46 = arith.select %43, %40, %45 : vector<8x128xi1>, vector<8x128xf32>
    %47 = math.tanh %46 : vector<8x128xf32>
    %cst_17 = arith.constant 5.000000e-01 : f32
    %48 = vector.broadcast %cst_17 : f32 to vector<8x128xf32>
    %49 = arith.mulf %48, %47 : vector<8x128xf32>
    %cst_18 = arith.constant 5.000000e-01 : f32
    %50 = vector.broadcast %cst_18 : f32 to vector<8x128xf32>
    %51 = arith.addf %49, %50 : vector<8x128xf32>
    %52 = arith.select %43, %47, %51 : vector<8x128xi1>, vector<8x128xf32>
    %53 = vector.extract_strided_slice %52 {offsets = [0, 0], sizes = [8, 32], strides = [1, 1]} : vector<8x128xf32> to vector<8x32xf32>
    %54 = vector.extract_strided_slice %52 {offsets = [0, 32], sizes = [8, 32], strides = [1, 1]} : vector<8x128xf32> to vector<8x32xf32>
    %55 = vector.extract_strided_slice %52 {offsets = [0, 64], sizes = [8, 32], strides = [1, 1]} : vector<8x128xf32> to vector<8x32xf32>
    %56 = vector.extract_strided_slice %52 {offsets = [0, 96], sizes = [8, 32], strides = [1, 1]} : vector<8x128xf32> to vector<8x32xf32>
    %57 = arith.mulf %54, %31 : vector<8x32xf32>
    %58 = arith.mulf %53, %56 : vector<8x32xf32>
    %59 = arith.addf %57, %58 : vector<8x32xf32>
    %60 = math.tanh %59 : vector<8x32xf32>
    %61 = arith.mulf %55, %60 : vector<8x32xf32>
    %c2_i32 = arith.constant 2 : i32
    %62 = arith.index_cast %c2_i32 : i32 to index
    %c0_19 = arith.constant 0 : index
    %c0_20 = arith.constant 0 : index
    %63 = vector.load %arg2[%62, %c0_19, %c0_20] : memref<8x8x128xbf16, #tpu.memory_space<vmem>>, vector<1x8x128xbf16>
    %64 = vector.shape_cast %63 : vector<1x8x128xbf16> to vector<8x128xbf16>
    %65 = arith.extf %64 : vector<8x128xbf16> to vector<8x128xf32>
    %66 = arith.truncf %61 : vector<8x32xf32> to vector<8x32xbf16>
    %cst_21 = arith.constant dense<0.000000e+00> : vector<8x128xf32>
    %67 = tpu.matmul %66, %3, %cst_21 {dimension_numbers = #tpu.dot_dimension_numbers<[1], [0], [0], [1], [0, 0, 1, 1], [], []>} : vector<8x32xbf16>, vector<32x128xbf16>, vector<8x128xf32> -> vector<8x128xf32>
    %68 = arith.addf %65, %67 : vector<8x128xf32>
    %69 = tpu.iota {dimensions = array<i32: 1>} : vector<8x128xi32>
    %c96_i32_22 = arith.constant 96 : i32
    %70 = vector.broadcast %c96_i32_22 : i32 to vector<8x128xi32>
    %71 = arith.cmpi sge, %69, %70 : vector<8x128xi32>
    %cst_23 = arith.constant 5.000000e-01 : f32
    %72 = vector.broadcast %cst_23 : f32 to vector<8x128xf32>
    %73 = arith.mulf %72, %68 : vector<8x128xf32>
    %74 = arith.select %71, %68, %73 : vector<8x128xi1>, vector<8x128xf32>
    %75 = math.tanh %74 : vector<8x128xf32>
    %cst_24 = arith.constant 5.000000e-01 : f32
    %76 = vector.broadcast %cst_24 : f32 to vector<8x128xf32>
    %77 = arith.mulf %76, %75 : vector<8x128xf32>
    %cst_25 = arith.constant 5.000000e-01 : f32
    %78 = vector.broadcast %cst_25 : f32 to vector<8x128xf32>
    %79 = arith.addf %77, %78 : vector<8x128xf32>
    %80 = arith.select %71, %75, %79 : vector<8x128xi1>, vector<8x128xf32>
    %81 = vector.extract_strided_slice %80 {offsets = [0, 0], sizes = [8, 32], strides = [1, 1]} : vector<8x128xf32> to vector<8x32xf32>
    %82 = vector.extract_strided_slice %80 {offsets = [0, 32], sizes = [8, 32], strides = [1, 1]} : vector<8x128xf32> to vector<8x32xf32>
    %83 = vector.extract_strided_slice %80 {offsets = [0, 64], sizes = [8, 32], strides = [1, 1]} : vector<8x128xf32> to vector<8x32xf32>
    %84 = vector.extract_strided_slice %80 {offsets = [0, 96], sizes = [8, 32], strides = [1, 1]} : vector<8x128xf32> to vector<8x32xf32>
    %85 = arith.mulf %82, %59 : vector<8x32xf32>
    %86 = arith.mulf %81, %84 : vector<8x32xf32>
    %87 = arith.addf %85, %86 : vector<8x32xf32>
    %88 = math.tanh %87 : vector<8x32xf32>
    %89 = arith.mulf %83, %88 : vector<8x32xf32>
    %c3_i32 = arith.constant 3 : i32
    %90 = arith.index_cast %c3_i32 : i32 to index
    %c0_26 = arith.constant 0 : index
    %c0_27 = arith.constant 0 : index
    %91 = vector.load %arg2[%90, %c0_26, %c0_27] : memref<8x8x128xbf16, #tpu.memory_space<vmem>>, vector<1x8x128xbf16>
    %92 = vector.shape_cast %91 : vector<1x8x128xbf16> to vector<8x128xbf16>
    %93 = arith.extf %92 : vector<8x128xbf16> to vector<8x128xf32>
    %94 = arith.truncf %89 : vector<8x32xf32> to vector<8x32xbf16>
    %cst_28 = arith.constant dense<0.000000e+00> : vector<8x128xf32>
    %95 = tpu.matmul %94, %3, %cst_28 {dimension_numbers = #tpu.dot_dimension_numbers<[1], [0], [0], [1], [0, 0, 1, 1], [], []>} : vector<8x32xbf16>, vector<32x128xbf16>, vector<8x128xf32> -> vector<8x128xf32>
    %96 = arith.addf %93, %95 : vector<8x128xf32>
    %97 = tpu.iota {dimensions = array<i32: 1>} : vector<8x128xi32>
    %c96_i32_29 = arith.constant 96 : i32
    %98 = vector.broadcast %c96_i32_29 : i32 to vector<8x128xi32>
    %99 = arith.cmpi sge, %97, %98 : vector<8x128xi32>
    %cst_30 = arith.constant 5.000000e-01 : f32
    %100 = vector.broadcast %cst_30 : f32 to vector<8x128xf32>
    %101 = arith.mulf %100, %96 : vector<8x128xf32>
    %102 = arith.select %99, %96, %101 : vector<8x128xi1>, vector<8x128xf32>
    %103 = math.tanh %102 : vector<8x128xf32>
    %cst_31 = arith.constant 5.000000e-01 : f32
    %104 = vector.broadcast %cst_31 : f32 to vector<8x128xf32>
    %105 = arith.mulf %104, %103 : vector<8x128xf32>
    %cst_32 = arith.constant 5.000000e-01 : f32
    %106 = vector.broadcast %cst_32 : f32 to vector<8x128xf32>
    %107 = arith.addf %105, %106 : vector<8x128xf32>
    %108 = arith.select %99, %103, %107 : vector<8x128xi1>, vector<8x128xf32>
    %109 = vector.extract_strided_slice %108 {offsets = [0, 0], sizes = [8, 32], strides = [1, 1]} : vector<8x128xf32> to vector<8x32xf32>
    %110 = vector.extract_strided_slice %108 {offsets = [0, 32], sizes = [8, 32], strides = [1, 1]} : vector<8x128xf32> to vector<8x32xf32>
    %111 = vector.extract_strided_slice %108 {offsets = [0, 64], sizes = [8, 32], strides = [1, 1]} : vector<8x128xf32> to vector<8x32xf32>
    %112 = vector.extract_strided_slice %108 {offsets = [0, 96], sizes = [8, 32], strides = [1, 1]} : vector<8x128xf32> to vector<8x32xf32>
    %113 = arith.mulf %110, %87 : vector<8x32xf32>
    %114 = arith.mulf %109, %112 : vector<8x32xf32>
    %115 = arith.addf %113, %114 : vector<8x32xf32>
    %116 = math.tanh %115 : vector<8x32xf32>
    %117 = arith.mulf %111, %116 : vector<8x32xf32>
    %c4_i32 = arith.constant 4 : i32
    %118 = arith.index_cast %c4_i32 : i32 to index
    %c0_33 = arith.constant 0 : index
    %c0_34 = arith.constant 0 : index
    %119 = vector.load %arg2[%118, %c0_33, %c0_34] : memref<8x8x128xbf16, #tpu.memory_space<vmem>>, vector<1x8x128xbf16>
    %120 = vector.shape_cast %119 : vector<1x8x128xbf16> to vector<8x128xbf16>
    %121 = arith.extf %120 : vector<8x128xbf16> to vector<8x128xf32>
    %122 = arith.truncf %117 : vector<8x32xf32> to vector<8x32xbf16>
    %cst_35 = arith.constant dense<0.000000e+00> : vector<8x128xf32>
    %123 = tpu.matmul %122, %3, %cst_35 {dimension_numbers = #tpu.dot_dimension_numbers<[1], [0], [0], [1], [0, 0, 1, 1], [], []>} : vector<8x32xbf16>, vector<32x128xbf16>, vector<8x128xf32> -> vector<8x128xf32>
    %124 = arith.addf %121, %123 : vector<8x128xf32>
    %125 = tpu.iota {dimensions = array<i32: 1>} : vector<8x128xi32>
    %c96_i32_36 = arith.constant 96 : i32
    %126 = vector.broadcast %c96_i32_36 : i32 to vector<8x128xi32>
    %127 = arith.cmpi sge, %125, %126 : vector<8x128xi32>
    %cst_37 = arith.constant 5.000000e-01 : f32
    %128 = vector.broadcast %cst_37 : f32 to vector<8x128xf32>
    %129 = arith.mulf %128, %124 : vector<8x128xf32>
    %130 = arith.select %127, %124, %129 : vector<8x128xi1>, vector<8x128xf32>
    %131 = math.tanh %130 : vector<8x128xf32>
    %cst_38 = arith.constant 5.000000e-01 : f32
    %132 = vector.broadcast %cst_38 : f32 to vector<8x128xf32>
    %133 = arith.mulf %132, %131 : vector<8x128xf32>
    %cst_39 = arith.constant 5.000000e-01 : f32
    %134 = vector.broadcast %cst_39 : f32 to vector<8x128xf32>
    %135 = arith.addf %133, %134 : vector<8x128xf32>
    %136 = arith.select %127, %131, %135 : vector<8x128xi1>, vector<8x128xf32>
    %137 = vector.extract_strided_slice %136 {offsets = [0, 0], sizes = [8, 32], strides = [1, 1]} : vector<8x128xf32> to vector<8x32xf32>
    %138 = vector.extract_strided_slice %136 {offsets = [0, 32], sizes = [8, 32], strides = [1, 1]} : vector<8x128xf32> to vector<8x32xf32>
    %139 = vector.extract_strided_slice %136 {offsets = [0, 64], sizes = [8, 32], strides = [1, 1]} : vector<8x128xf32> to vector<8x32xf32>
    %140 = vector.extract_strided_slice %136 {offsets = [0, 96], sizes = [8, 32], strides = [1, 1]} : vector<8x128xf32> to vector<8x32xf32>
    %141 = arith.mulf %138, %115 : vector<8x32xf32>
    %142 = arith.mulf %137, %140 : vector<8x32xf32>
    %143 = arith.addf %141, %142 : vector<8x32xf32>
    %144 = math.tanh %143 : vector<8x32xf32>
    %145 = arith.mulf %139, %144 : vector<8x32xf32>
    %c5_i32 = arith.constant 5 : i32
    %146 = arith.index_cast %c5_i32 : i32 to index
    %c0_40 = arith.constant 0 : index
    %c0_41 = arith.constant 0 : index
    %147 = vector.load %arg2[%146, %c0_40, %c0_41] : memref<8x8x128xbf16, #tpu.memory_space<vmem>>, vector<1x8x128xbf16>
    %148 = vector.shape_cast %147 : vector<1x8x128xbf16> to vector<8x128xbf16>
    %149 = arith.extf %148 : vector<8x128xbf16> to vector<8x128xf32>
    %150 = arith.truncf %145 : vector<8x32xf32> to vector<8x32xbf16>
    %cst_42 = arith.constant dense<0.000000e+00> : vector<8x128xf32>
    %151 = tpu.matmul %150, %3, %cst_42 {dimension_numbers = #tpu.dot_dimension_numbers<[1], [0], [0], [1], [0, 0, 1, 1], [], []>} : vector<8x32xbf16>, vector<32x128xbf16>, vector<8x128xf32> -> vector<8x128xf32>
    %152 = arith.addf %149, %151 : vector<8x128xf32>
    %153 = tpu.iota {dimensions = array<i32: 1>} : vector<8x128xi32>
    %c96_i32_43 = arith.constant 96 : i32
    %154 = vector.broadcast %c96_i32_43 : i32 to vector<8x128xi32>
    %155 = arith.cmpi sge, %153, %154 : vector<8x128xi32>
    %cst_44 = arith.constant 5.000000e-01 : f32
    %156 = vector.broadcast %cst_44 : f32 to vector<8x128xf32>
    %157 = arith.mulf %156, %152 : vector<8x128xf32>
    %158 = arith.select %155, %152, %157 : vector<8x128xi1>, vector<8x128xf32>
    %159 = math.tanh %158 : vector<8x128xf32>
    %cst_45 = arith.constant 5.000000e-01 : f32
    %160 = vector.broadcast %cst_45 : f32 to vector<8x128xf32>
    %161 = arith.mulf %160, %159 : vector<8x128xf32>
    %cst_46 = arith.constant 5.000000e-01 : f32
    %162 = vector.broadcast %cst_46 : f32 to vector<8x128xf32>
    %163 = arith.addf %161, %162 : vector<8x128xf32>
    %164 = arith.select %155, %159, %163 : vector<8x128xi1>, vector<8x128xf32>
    %165 = vector.extract_strided_slice %164 {offsets = [0, 0], sizes = [8, 32], strides = [1, 1]} : vector<8x128xf32> to vector<8x32xf32>
    %166 = vector.extract_strided_slice %164 {offsets = [0, 32], sizes = [8, 32], strides = [1, 1]} : vector<8x128xf32> to vector<8x32xf32>
    %167 = vector.extract_strided_slice %164 {offsets = [0, 64], sizes = [8, 32], strides = [1, 1]} : vector<8x128xf32> to vector<8x32xf32>
    %168 = vector.extract_strided_slice %164 {offsets = [0, 96], sizes = [8, 32], strides = [1, 1]} : vector<8x128xf32> to vector<8x32xf32>
    %169 = arith.mulf %166, %143 : vector<8x32xf32>
    %170 = arith.mulf %165, %168 : vector<8x32xf32>
    %171 = arith.addf %169, %170 : vector<8x32xf32>
    %172 = math.tanh %171 : vector<8x32xf32>
    %173 = arith.mulf %167, %172 : vector<8x32xf32>
    %c6_i32 = arith.constant 6 : i32
    %174 = arith.index_cast %c6_i32 : i32 to index
    %c0_47 = arith.constant 0 : index
    %c0_48 = arith.constant 0 : index
    %175 = vector.load %arg2[%174, %c0_47, %c0_48] : memref<8x8x128xbf16, #tpu.memory_space<vmem>>, vector<1x8x128xbf16>
    %176 = vector.shape_cast %175 : vector<1x8x128xbf16> to vector<8x128xbf16>
    %177 = arith.extf %176 : vector<8x128xbf16> to vector<8x128xf32>
    %178 = arith.truncf %173 : vector<8x32xf32> to vector<8x32xbf16>
    %cst_49 = arith.constant dense<0.000000e+00> : vector<8x128xf32>
    %179 = tpu.matmul %178, %3, %cst_49 {dimension_numbers = #tpu.dot_dimension_numbers<[1], [0], [0], [1], [0, 0, 1, 1], [], []>} : vector<8x32xbf16>, vector<32x128xbf16>, vector<8x128xf32> -> vector<8x128xf32>
    %180 = arith.addf %177, %179 : vector<8x128xf32>
    %181 = tpu.iota {dimensions = array<i32: 1>} : vector<8x128xi32>
    %c96_i32_50 = arith.constant 96 : i32
    %182 = vector.broadcast %c96_i32_50 : i32 to vector<8x128xi32>
    %183 = arith.cmpi sge, %181, %182 : vector<8x128xi32>
    %cst_51 = arith.constant 5.000000e-01 : f32
    %184 = vector.broadcast %cst_51 : f32 to vector<8x128xf32>
    %185 = arith.mulf %184, %180 : vector<8x128xf32>
    %186 = arith.select %183, %180, %185 : vector<8x128xi1>, vector<8x128xf32>
    %187 = math.tanh %186 : vector<8x128xf32>
    %cst_52 = arith.constant 5.000000e-01 : f32
    %188 = vector.broadcast %cst_52 : f32 to vector<8x128xf32>
    %189 = arith.mulf %188, %187 : vector<8x128xf32>
    %cst_53 = arith.constant 5.000000e-01 : f32
    %190 = vector.broadcast %cst_53 : f32 to vector<8x128xf32>
    %191 = arith.addf %189, %190 : vector<8x128xf32>
    %192 = arith.select %183, %187, %191 : vector<8x128xi1>, vector<8x128xf32>
    %193 = vector.extract_strided_slice %192 {offsets = [0, 0], sizes = [8, 32], strides = [1, 1]} : vector<8x128xf32> to vector<8x32xf32>
    %194 = vector.extract_strided_slice %192 {offsets = [0, 32], sizes = [8, 32], strides = [1, 1]} : vector<8x128xf32> to vector<8x32xf32>
    %195 = vector.extract_strided_slice %192 {offsets = [0, 64], sizes = [8, 32], strides = [1, 1]} : vector<8x128xf32> to vector<8x32xf32>
    %196 = vector.extract_strided_slice %192 {offsets = [0, 96], sizes = [8, 32], strides = [1, 1]} : vector<8x128xf32> to vector<8x32xf32>
    %197 = arith.mulf %194, %171 : vector<8x32xf32>
    %198 = arith.mulf %193, %196 : vector<8x32xf32>
    %199 = arith.addf %197, %198 : vector<8x32xf32>
    %200 = math.tanh %199 : vector<8x32xf32>
    %201 = arith.mulf %195, %200 : vector<8x32xf32>
    %c7_i32 = arith.constant 7 : i32
    %202 = arith.index_cast %c7_i32 : i32 to index
    %c0_54 = arith.constant 0 : index
    %c0_55 = arith.constant 0 : index
    %203 = vector.load %arg2[%202, %c0_54, %c0_55] : memref<8x8x128xbf16, #tpu.memory_space<vmem>>, vector<1x8x128xbf16>
    %204 = vector.shape_cast %203 : vector<1x8x128xbf16> to vector<8x128xbf16>
    %205 = arith.extf %204 : vector<8x128xbf16> to vector<8x128xf32>
    %206 = arith.truncf %201 : vector<8x32xf32> to vector<8x32xbf16>
    %cst_56 = arith.constant dense<0.000000e+00> : vector<8x128xf32>
    %207 = tpu.matmul %206, %3, %cst_56 {dimension_numbers = #tpu.dot_dimension_numbers<[1], [0], [0], [1], [0, 0, 1, 1], [], []>} : vector<8x32xbf16>, vector<32x128xbf16>, vector<8x128xf32> -> vector<8x128xf32>
    %208 = arith.addf %205, %207 : vector<8x128xf32>
    %209 = tpu.iota {dimensions = array<i32: 1>} : vector<8x128xi32>
    %c96_i32_57 = arith.constant 96 : i32
    %210 = vector.broadcast %c96_i32_57 : i32 to vector<8x128xi32>
    %211 = arith.cmpi sge, %209, %210 : vector<8x128xi32>
    %cst_58 = arith.constant 5.000000e-01 : f32
    %212 = vector.broadcast %cst_58 : f32 to vector<8x128xf32>
    %213 = arith.mulf %212, %208 : vector<8x128xf32>
    %214 = arith.select %211, %208, %213 : vector<8x128xi1>, vector<8x128xf32>
    %215 = math.tanh %214 : vector<8x128xf32>
    %cst_59 = arith.constant 5.000000e-01 : f32
    %216 = vector.broadcast %cst_59 : f32 to vector<8x128xf32>
    %217 = arith.mulf %216, %215 : vector<8x128xf32>
    %cst_60 = arith.constant 5.000000e-01 : f32
    %218 = vector.broadcast %cst_60 : f32 to vector<8x128xf32>
    %219 = arith.addf %217, %218 : vector<8x128xf32>
    %220 = arith.select %211, %215, %219 : vector<8x128xi1>, vector<8x128xf32>
    %221 = vector.extract_strided_slice %220 {offsets = [0, 0], sizes = [8, 32], strides = [1, 1]} : vector<8x128xf32> to vector<8x32xf32>
    %222 = vector.extract_strided_slice %220 {offsets = [0, 32], sizes = [8, 32], strides = [1, 1]} : vector<8x128xf32> to vector<8x32xf32>
    %223 = vector.extract_strided_slice %220 {offsets = [0, 64], sizes = [8, 32], strides = [1, 1]} : vector<8x128xf32> to vector<8x32xf32>
    %224 = vector.extract_strided_slice %220 {offsets = [0, 96], sizes = [8, 32], strides = [1, 1]} : vector<8x128xf32> to vector<8x32xf32>
    %225 = arith.mulf %222, %199 : vector<8x32xf32>
    %226 = arith.mulf %221, %224 : vector<8x32xf32>
    %227 = arith.addf %225, %226 : vector<8x32xf32>
    %228 = math.tanh %227 : vector<8x32xf32>
    %229 = arith.mulf %223, %228 : vector<8x32xf32>
    %c8_i32 = arith.constant 8 : i32
    %c0_61 = arith.constant 0 : index
    %c0_62 = arith.constant 0 : index
    %230 = vector.load %arg9[%c0_61, %c0_62] : memref<8x32xf32, #tpu.memory_space<vmem>>, vector<8x32xf32>
    tpu.vector_store %arg9[%c0_61, %c0_62], %229 {strides = array<i32>} : memref<8x32xf32, #tpu.memory_space<vmem>>, vector<8x32xf32>,
    %c0_63 = arith.constant 0 : index
    %c0_64 = arith.constant 0 : index
    %231 = vector.load %arg10[%c0_63, %c0_64] : memref<8x32xf32, #tpu.memory_space<vmem>>, vector<8x32xf32>
    tpu.vector_store %arg10[%c0_63, %c0_64], %227 {strides = array<i32>} : memref<8x32xf32, #tpu.memory_space<vmem>>, vector<8x32xf32>,
    %c0_i32_65 = arith.constant 0 : i32
    %232 = arith.cmpi eq, %arg1, %c0_i32_65 : i32
    %233 = arith.extui %232 : i1 to i32
    %c0_i32_66 = arith.constant 0 : i32
    %234 = arith.cmpi ne, %233, %c0_i32_66 : i32
    scf.if %234 {
      %c0_67 = arith.constant 0 : index
      %c0_68 = arith.constant 0 : index
      %235 = vector.load %arg4[%c0_67, %c0_68] : memref<8x128xf32, #tpu.memory_space<vmem>>, vector<8x128xf32>
      %cst_69 = arith.constant 0.000000e+00 : f32
      %236 = vector.broadcast %cst_69 : f32 to vector<8x32xf32>
      %237 = tpu.iota {dimensions = array<i32: 1>} : vector<8x128xi32>
      %c96_i32_70 = arith.constant 96 : i32
      %238 = vector.broadcast %c96_i32_70 : i32 to vector<8x128xi32>
      %239 = arith.cmpi sge, %237, %238 : vector<8x128xi32>
      %cst_71 = arith.constant 5.000000e-01 : f32
      %240 = vector.broadcast %cst_71 : f32 to vector<8x128xf32>
      %241 = arith.mulf %240, %235 : vector<8x128xf32>
      %242 = arith.select %239, %235, %241 : vector<8x128xi1>, vector<8x128xf32>
      %243 = math.tanh %242 : vector<8x128xf32>
      %cst_72 = arith.constant 5.000000e-01 : f32
      %244 = vector.broadcast %cst_72 : f32 to vector<8x128xf32>
      %245 = arith.mulf %244, %243 : vector<8x128xf32>
      %cst_73 = arith.constant 5.000000e-01 : f32
      %246 = vector.broadcast %cst_73 : f32 to vector<8x128xf32>
      %247 = arith.addf %245, %246 : vector<8x128xf32>
      %248 = arith.select %239, %243, %247 : vector<8x128xi1>, vector<8x128xf32>
      %249 = vector.extract_strided_slice %248 {offsets = [0, 0], sizes = [8, 32], strides = [1, 1]} : vector<8x128xf32> to vector<8x32xf32>
      %250 = vector.extract_strided_slice %248 {offsets = [0, 32], sizes = [8, 32], strides = [1, 1]} : vector<8x128xf32> to vector<8x32xf32>
      %251 = vector.extract_strided_slice %248 {offsets = [0, 64], sizes = [8, 32], strides = [1, 1]} : vector<8x128xf32> to vector<8x32xf32>
      %252 = vector.extract_strided_slice %248 {offsets = [0, 96], sizes = [8, 32], strides = [1, 1]} : vector<8x128xf32> to vector<8x32xf32>
      %253 = arith.mulf %250, %236 : vector<8x32xf32>
      %254 = arith.mulf %249, %252 : vector<8x32xf32>
      %255 = arith.addf %253, %254 : vector<8x32xf32>
      %256 = math.tanh %255 : vector<8x32xf32>
      %257 = arith.mulf %251, %256 : vector<8x32xf32>
      %258 = arith.truncf %229 : vector<8x32xf32> to vector<8x32xbf16>
      %c0_74 = arith.constant 0 : index
      %c0_75 = arith.constant 0 : index
      %259 = vector.load %arg5[%c0_74, %c0_75] : memref<32x1xbf16, #tpu.memory_space<vmem>>, vector<32x1xbf16>
      %cst_76 = arith.constant dense<0.000000e+00> : vector<8x1xf32>
      %260 = tpu.matmul %258, %259, %cst_76 {dimension_numbers = #tpu.dot_dimension_numbers<[1], [0], [0], [1], [0, 0, 1, 1], [], []>} : vector<8x32xbf16>, vector<32x1xbf16>, vector<8x1xf32> -> vector<8x1xf32>
      %261 = arith.truncf %257 : vector<8x32xf32> to vector<8x32xbf16>
      %c0_77 = arith.constant 0 : index
      %c0_78 = arith.constant 0 : index
      %262 = vector.load %arg6[%c0_77, %c0_78] : memref<32x1xbf16, #tpu.memory_space<vmem>>, vector<32x1xbf16>
      %cst_79 = arith.constant dense<0.000000e+00> : vector<8x1xf32>
      %263 = tpu.matmul %261, %262, %cst_79 {dimension_numbers = #tpu.dot_dimension_numbers<[1], [0], [0], [1], [0, 0, 1, 1], [], []>} : vector<8x32xbf16>, vector<32x1xbf16>, vector<8x1xf32> -> vector<8x1xf32>
      %264 = arith.addf %260, %263 : vector<8x1xf32>
      %c0_80 = arith.constant 0 : index
      %c0_81 = arith.constant 0 : index
      %265 = vector.load %arg7[%c0_80, %c0_81] : memref<1x1xf32, #tpu.memory_space<vmem>>, vector<1x1xf32>
      %266 = vector.broadcast %265 : vector<1x1xf32> to vector<8x1xf32>
      %267 = arith.addf %264, %266 : vector<8x1xf32>
      %cst_82 = arith.constant 5.000000e-01 : f32
      %268 = vector.broadcast %cst_82 : f32 to vector<8x1xf32>
      %269 = arith.mulf %268, %267 : vector<8x1xf32>
      %270 = math.tanh %269 : vector<8x1xf32>
      %cst_83 = arith.constant 5.000000e-01 : f32
      %271 = vector.broadcast %cst_83 : f32 to vector<8x1xf32>
      %272 = arith.mulf %271, %270 : vector<8x1xf32>
      %cst_84 = arith.constant 5.000000e-01 : f32
      %273 = vector.broadcast %cst_84 : f32 to vector<8x1xf32>
      %274 = arith.addf %272, %273 : vector<8x1xf32>
      %c0_85 = arith.constant 0 : index
      %c0_86 = arith.constant 0 : index
      %275 = vector.load %arg8[%c0_85, %c0_86] : memref<8x1xf32, #tpu.memory_space<vmem>>, vector<8x1xf32>
      tpu.vector_store %arg8[%c0_85, %c0_86], %274 {strides = array<i32>} : memref<8x1xf32, #tpu.memory_space<vmem>>, vector<8x1xf32>,
    } else {
    }
    return
  }
  func.func @transform_0(%arg0: i32, %arg1: i32) -> (i32, i32, i32) {
    %c0_i32 = arith.constant 0 : i32
    %c0_i32_0 = arith.constant 0 : i32
    return %arg1, %arg0, %c0_i32 : i32, i32, i32
  }
  func.func @transform_1(%arg0: i32, %arg1: i32) -> (i32, i32) {
    %c0_i32 = arith.constant 0 : i32
    %c0_i32_0 = arith.constant 0 : i32
    %c0_i32_1 = arith.constant 0 : i32
    return %c0_i32, %c0_i32_0 : i32, i32
  }
  func.func @transform_2(%arg0: i32, %arg1: i32) -> (i32, i32) {
    %c0_i32 = arith.constant 0 : i32
    %c0_i32_0 = arith.constant 0 : i32
    return %arg0, %c0_i32 : i32, i32
  }
  func.func @transform_3(%arg0: i32, %arg1: i32) -> (i32, i32) {
    %c0_i32 = arith.constant 0 : i32
    %c0_i32_0 = arith.constant 0 : i32
    %c0_i32_1 = arith.constant 0 : i32
    return %c0_i32, %c0_i32_0 : i32, i32
  }
  func.func @transform_4(%arg0: i32, %arg1: i32) -> (i32, i32) {
    %c0_i32 = arith.constant 0 : i32
    %c0_i32_0 = arith.constant 0 : i32
    %c0_i32_1 = arith.constant 0 : i32
    return %c0_i32, %c0_i32_0 : i32, i32
  }
  func.func @transform_5(%arg0: i32, %arg1: i32) -> (i32, i32) {
    %c0_i32 = arith.constant 0 : i32
    %c0_i32_0 = arith.constant 0 : i32
    %c0_i32_1 = arith.constant 0 : i32
    return %c0_i32, %c0_i32_0 : i32, i32
  }
  func.func @transform_6(%arg0: i32, %arg1: i32) -> (i32, i32) {
    %c0_i32 = arith.constant 0 : i32
    %c0_i32_0 = arith.constant 0 : i32
    return %arg0, %c0_i32 : i32, i32
  }
}

</mosaic_0001>

<bundles_post_ra>
// kernel: sentiment_rnn_forward.1
= control target key start
LH: loop header
LB: loop body
LE: loop exit
PB: predicated region body
PF: predicated region fallthrough
CT: control target
= control target key end

     0   :  { %vm30_vm0 = vcmask 261120   ;;  %v645_v1 = vmov 0.0   ;;  %v72_v6 = vlaneseq  ;;  %s646_s26 = smov 32   ;;  %s647_s27 = smov 64   ;;  %vm549_vm2 = vcmask 7168   ;;  %s817_s1 = inlined_call_operand.vmem [shape: bf16[32,128], index: 1, kind: input, shape index: {}]   ;;  %s818_s0 = inlined_call_operand.vmem [shape: bf16[8,8,128], index: 0, kind: input, shape index: {}]   ;;  %s819_s2 = inlined_call_operand.vmem [shape: f32[8,128], index: 2, kind: input, shape index: {}]   ;;  %s820_s4 = inlined_call_operand.vmem [shape: bf16[32,1], index: 4, kind: input, shape index: {}]   ;;  %s821_s3 = inlined_call_operand.vmem [shape: bf16[32,1], index: 3, kind: input, shape index: {}]   ;;  %s822_s5 = inlined_call_operand.<no memory space> [shape: f32[1,1], index: 5, kind: input, shape index: {}]   ;;  %s823_s6 = inlined_call_operand.vmem [shape: f32[8,1], index: 6, kind: output, shape index: {}]  }
   0x1   :  { %v597_v0 = vld [vmem:[%s817_s1 + $0x8] sm:$0xff]  ;;  %31 = vst.msk [vmem:[#allocation2] sm:$0xff] %vm30_vm0, %v645_v1  ;;  %v596_v2 = vld [vmem:[%s817_s1] sm:$0xff] }
   0x2   :  { %32 = vst.msk [vmem:[#allocation3] sm:$0xff] %vm30_vm0, %v645_v1  ;;  %64 = vmatpush.bf16.msra.mxu0 %v597_v0  ;;  %118 = vmatpush.bf16.msra.mxu1 %v597_v0  ;;  %v39_v5 = vld [vmem:[%s818_s0] sm:$0xff]   ;;  %v696_v8 = vand.u32 127, %v72_v6  ;;  %v566_v50 = vld [vmem:[%s818_s0 + $0x8] sm:$0xff]  }
   0x3   :  { %165 = vmatpush.bf16.msra.mxu2 %v597_v0  ;;  %212 = vmatpush.bf16.msra.mxu3 %v597_v0  ;;  %v40_v7 = vunpack.c.l.bf16 %v39_v5  ;;  %v104_v30 = vunpack.c.h.bf16 %v39_v5  ;;  %v151_v51 = vunpack.c.l.bf16 %v566_v50 }
   0x4   :  { %vm74_vm1 = vcmp.ge.s32.totalorder %v696_v8, 96 }
   0x6   :  { %65 = vmatpush.bf16.msra.mxu0 %v596_v2  ;;  %119 = vmatpush.bf16.msra.mxu1 %v596_v2 }
   0x7   :  { %166 = vmatpush.bf16.msra.mxu2 %v596_v2  ;;  %213 = vmatpush.bf16.msra.mxu3 %v596_v2 }
   0x8   :  { %v37_v3 = vld [vmem:[#allocation2] sm:$0xff] }
   0x9   :  { %v41_v4 = vpack.c.bf16 %v37_v3, %v37_v3  ;;  %v38_v18 = vld [vmem:[#allocation3] sm:$0xff] }
   0xa   :  { %259 = vmatpush.bf16.msrb.mxu0 %v597_v0  ;;  %306 = vmatpush.bf16.msrb.mxu1 %v597_v0 }
   0xb   :  { %353 = vmatpush.bf16.msrb.mxu2 %v597_v0  ;;  %400 = vmatpush.bf16.msrb.mxu3 %v597_v0 }
   0xc   :  { %563 = vmatmul.msk.bf16.vlgmr.msra.gmra.mxu0 %vm30_vm0, %v41_v4 }
   0xe   :  { %260 = vmatpush.bf16.msrb.mxu0 %v596_v2  ;;  %307 = vmatpush.bf16.msrb.mxu1 %v596_v2 }
   0xf   :  { %354 = vmatpush.bf16.msrb.mxu2 %v596_v2  ;;  %401 = vmatpush.bf16.msrb.mxu3 %v596_v2 }
  0x89   :  { %v67_v9 = vpop.f32.mrf.mxu0 }
  0x8a   :  { %v71_v10 = vadd.f32 %v67_v9, %v40_v7  ;;  %v198_v7 = vunpack.c.h.bf16 %v566_v50 }
  0x8c   :  { %v75_v11 = vmul.f32 0.5, %v71_v10 }
  0x8e   :  { %v76_v12 = vsel %vm74_vm1, %v71_v10, %v75_v11 }
  0x8f   :  { %607 = vtanh.f32 %v76_v12 }
  0x91   :  { %v69_v13 = vpop.f32.mrf.mxu0 }
  0x95   :  { %v608_v14 = vpop.eup %607 }
  0x96   :  { %v78_v15 = vmul.f32 0.5, %v608_v14 }
  0x98   :  { %v79_v16 = vadd.f32 0.5, %v78_v15 }
  0x9a   :  { %v80_v17 = vsel %vm74_vm1, %v608_v14, %v79_v16 }
  0x9b   :  { %87 = vrot.lane.b32.xlu0 %v80_v17, %s646_s26 }
  0xa3   :  { %82 = vrot.lane.b32.xlu0 %v38_v18, %s646_s26 }
 0x10d   :  { %v88_v19 = vpop.permute.xlu0 %87 }
 0x10e   :  { %v90_v20 = vmul.f32 %v88_v19, %v80_v17 }
 0x110   :  { %92 = vrot.lane.b32.xlu1 %v90_v20, %s646_s26 }
 0x115   :  { %v83_v21 = vpop.permute.xlu0 %82 }
 0x116   :  { %v85_v22 = vmul.f32 %v83_v21, %v80_v17 }
 0x182   :  { %v93_v23 = vpop.permute.xlu1 %92 }
 0x183   :  { %v95_v24 = vadd.f32 %v93_v23, %v85_v22 }
 0x185   :  { %609 = vtanh.f32 %v95_v24 }
 0x18b   :  { %v610_v25 = vpop.eup %609 }
 0x18c   :  { %98 = vrot.lane.b32.xlu1 %v610_v25, %s646_s26 }
 0x1fe   :  { %v99_v26 = vpop.permute.xlu1 %98 }
 0x1ff   :  { %v101_v27 = vmul.f32 %v99_v26, %v80_v17 }
 0x201   :  { %v105_v28 = vpack.c.bf16 %v101_v27, %v101_v27 }
 0x203   :  { %107 = vrot.lane.b32.xlu2 %v105_v28, %s647_s27  ;;  %v570_v28 = vld [vmem:[%s818_s0 + $0x10] sm:$0xff]  }
 0x25d   :  { %v108_v29 = vpop.permute.xlu2 %107 }
 0x25e   :  { %565 = vmatmul.msk.bf16.vlgmr.msra.gmra.mxu1 %vm30_vm0, %v108_v29  ;;  %v245_v29 = vunpack.c.l.bf16 %v570_v28 }
 0x2db   :  { %v121_v31 = vpop.f32.mrf.mxu1 }
 0x2dc   :  { %v125_v32 = vadd.f32 %v121_v31, %v104_v30 }
 0x2de   :  { %v126_v33 = vmul.f32 0.5, %v125_v32 }
 0x2e0   :  { %v127_v34 = vsel %vm74_vm1, %v125_v32, %v126_v33 }
 0x2e1   :  { %611 = vtanh.f32 %v127_v34 }
 0x2e3   :  { %v123_v35 = vpop.f32.mrf.mxu1 }
 0x2e7   :  { %v612_v36 = vpop.eup %611 }
 0x2e8   :  { %v129_v37 = vmul.f32 0.5, %v612_v36 }
 0x2ea   :  { %v130_v38 = vadd.f32 0.5, %v129_v37 }
 0x2ec   :  { %v131_v39 = vsel %vm74_vm1, %v612_v36, %v130_v38 }
 0x2ed   :  { %134 = vrot.lane.b32.xlu2 %v131_v39, %s646_s26  ;;  %v132_v42 = vmul.f32 %v131_v39, %v95_v24 }
 0x347   :  { %v135_v40 = vpop.permute.xlu2 %134 }
 0x348   :  { %v137_v41 = vmul.f32 %v135_v40, %v131_v39 }
 0x34a   :  { %139 = vrot.lane.b32.xlu0 %v137_v41, %s646_s26 }
 0x3bc   :  { %v140_v43 = vpop.permute.xlu0 %139 }
 0x3bd   :  { %v142_v44 = vadd.f32 %v140_v43, %v132_v42 }
 0x3bf   :  { %613 = vtanh.f32 %v142_v44 }
 0x3c5   :  { %v614_v45 = vpop.eup %613 }
 0x3c6   :  { %145 = vrot.lane.b32.xlu1 %v614_v45, %s646_s26 }
 0x438   :  { %v146_v46 = vpop.permute.xlu1 %145 }
 0x439   :  { %v148_v47 = vmul.f32 %v146_v46, %v131_v39 }
 0x43b   :  { %v152_v48 = vpack.c.bf16 %v148_v47, %v148_v47 }
 0x43d   :  { %154 = vrot.lane.b32.xlu2 %v152_v48, %s647_s27 }
 0x497   :  { %v155_v49 = vpop.permute.xlu2 %154 }
 0x498   :  { %567 = vmatmul.msk.bf16.vlgmr.msra.gmra.mxu2 %vm30_vm0, %v155_v49  ;;  %v292_v49 = vunpack.c.h.bf16 %v570_v28 }
 0x51b   :  { %v168_v52 = vpop.f32.mrf.mxu2 }
 0x51c   :  { %v172_v53 = vadd.f32 %v168_v52, %v151_v51 }
 0x51e   :  { %v173_v54 = vmul.f32 0.5, %v172_v53 }
 0x520   :  { %v174_v55 = vsel %vm74_vm1, %v172_v53, %v173_v54 }
 0x521   :  { %615 = vtanh.f32 %v174_v55 }
 0x523   :  { %v170_v56 = vpop.f32.mrf.mxu2 }
 0x527   :  { %v616_v57 = vpop.eup %615 }
 0x528   :  { %v176_v58 = vmul.f32 0.5, %v616_v57 }
 0x52a   :  { %v177_v59 = vadd.f32 0.5, %v176_v58 }
 0x52c   :  { %v178_v60 = vsel %vm74_vm1, %v616_v57, %v177_v59 }
 0x52d   :  { %181 = vrot.lane.b32.xlu0 %v178_v60, %s646_s26  ;;  %v179_v63 = vmul.f32 %v178_v60, %v142_v44 }
 0x59f   :  { %v182_v61 = vpop.permute.xlu0 %181 }
 0x5a0   :  { %v184_v62 = vmul.f32 %v182_v61, %v178_v60 }
 0x5a2   :  { %186 = vrot.lane.b32.xlu1 %v184_v62, %s646_s26 }
 0x614   :  { %v187_v0 = vpop.permute.xlu1 %186 }
 0x615   :  { %v189_v1 = vadd.f32 %v187_v0, %v179_v63 }
 0x617   :  { %617 = vtanh.f32 %v189_v1 }
 0x61d   :  { %v618_v2 = vpop.eup %617 }
 0x61e   :  { %192 = vrot.lane.b32.xlu2 %v618_v2, %s646_s26 }
 0x678   :  { %v193_v3 = vpop.permute.xlu2 %192 }
 0x679   :  { %v195_v4 = vmul.f32 %v193_v3, %v178_v60 }
 0x67b   :  { %v199_v5 = vpack.c.bf16 %v195_v4, %v195_v4 }
 0x67d   :  { %201 = vrot.lane.b32.xlu0 %v199_v5, %s647_s27  ;;  %v574_v5 = vld [vmem:[%s818_s0 + $0x18] sm:$0xf] }
 0x6ef   :  { %v202_v6 = vpop.permute.xlu0 %201 }
 0x6f0   :  { %569 = vmatmul.msk.bf16.vlgmr.msra.gmra.mxu3 %vm30_vm0, %v202_v6  ;;  %v339_v6 = vunpack.c.l.bf16 %v574_v5 }
 0x773   :  { %v215_v9 = vpop.f32.mrf.mxu3 }
 0x774   :  { %v219_v10 = vadd.f32 %v215_v9, %v198_v7 }
 0x776   :  { %v220_v11 = vmul.f32 0.5, %v219_v10 }
 0x778   :  { %v221_v12 = vsel %vm74_vm1, %v219_v10, %v220_v11 }
 0x779   :  { %619 = vtanh.f32 %v221_v12 }
 0x77b   :  { %v217_v13 = vpop.f32.mrf.mxu3 }
 0x77f   :  { %v620_v14 = vpop.eup %619 }
 0x780   :  { %v223_v15 = vmul.f32 0.5, %v620_v14 }
 0x782   :  { %v224_v16 = vadd.f32 0.5, %v223_v15 }
 0x784   :  { %v225_v17 = vsel %vm74_vm1, %v620_v14, %v224_v16 }
 0x785   :  { %228 = vrot.lane.b32.xlu1 %v225_v17, %s646_s26  ;;  %v226_v20 = vmul.f32 %v225_v17, %v189_v1 }
 0x7f7   :  { %v229_v18 = vpop.permute.xlu1 %228 }
 0x7f8   :  { %v231_v19 = vmul.f32 %v229_v18, %v225_v17 }
 0x7fa   :  { %233 = vrot.lane.b32.xlu2 %v231_v19, %s646_s26 }
 0x854   :  { %v234_v21 = vpop.permute.xlu2 %233 }
 0x855   :  { %v236_v22 = vadd.f32 %v234_v21, %v226_v20 }
 0x857   :  { %621 = vtanh.f32 %v236_v22 }
 0x85d   :  { %v622_v23 = vpop.eup %621 }
 0x85e   :  { %239 = vrot.lane.b32.xlu0 %v622_v23, %s646_s26 }
 0x8d0   :  { %v240_v24 = vpop.permute.xlu0 %239 }
 0x8d1   :  { %v242_v25 = vmul.f32 %v240_v24, %v225_v17 }
 0x8d3   :  { %v246_v26 = vpack.c.bf16 %v242_v25, %v242_v25 }
 0x8d5   :  { %248 = vrot.lane.b32.xlu1 %v246_v26, %s647_s27  ;;  %v444_v26 = vld [vmem:[%s819_s2] sm:$0xff] }
 0x947   :  { %v249_v27 = vpop.permute.xlu1 %248 }
 0x948   :  { %571 = vmatmul.msk.bf16.vlgmr.msrb.gmra.mxu0 %vm30_vm0, %v249_v27  ;;  %v445_v27 = vmul.f32 0.5, %v444_v26 }
 0x94a   :  { %v446_v28 = vsel %vm74_vm1, %v444_v26, %v445_v27 }
 0x9c5   :  { %v262_v30 = vpop.f32.mrf.mxu0 }
 0x9c6   :  { %v266_v31 = vadd.f32 %v262_v30, %v245_v29 }
 0x9c8   :  { %v267_v32 = vmul.f32 0.5, %v266_v31 }
 0x9ca   :  { %v268_v33 = vsel %vm74_vm1, %v266_v31, %v267_v32 }
 0x9cb   :  { %623 = vtanh.f32 %v268_v33 }
 0x9cd   :  { %v264_v34 = vpop.f32.mrf.mxu0 }
 0x9ce   :  { %v576_v34 = vld [vmem:[%s818_s0 + $0x1c] sm:$0xf]  ;;  %s648_s0 = smov 96  }
 0x9d1   :  { %v624_v35 = vpop.eup %623 }
 0x9d2   :  { %v270_v36 = vmul.f32 0.5, %v624_v35 }
 0x9d4   :  { %v271_v37 = vadd.f32 0.5, %v270_v36 }
 0x9d6   :  { %v272_v38 = vsel %vm74_vm1, %v624_v35, %v271_v37  ;;  %v386_v35 = vunpack.c.l.bf16 %v576_v34 }
 0x9d7   :  { %275 = vrot.lane.b32.xlu2 %v272_v38, %s646_s26  ;;  %v273_v41 = vmul.f32 %v272_v38, %v236_v22 }
 0xa31   :  { %v276_v39 = vpop.permute.xlu2 %275 }
 0xa32   :  { %v278_v40 = vmul.f32 %v276_v39, %v272_v38 }
 0xa34   :  { %280 = vrot.lane.b32.xlu0 %v278_v40, %s646_s26 }
 0xaa6   :  { %v281_v42 = vpop.permute.xlu0 %280 }
 0xaa7   :  { %v283_v43 = vadd.f32 %v281_v42, %v273_v41 }
 0xaa9   :  { %625 = vtanh.f32 %v283_v43 }
 0xaaf   :  { %v626_v44 = vpop.eup %625 }
 0xab0   :  { %286 = vrot.lane.b32.xlu1 %v626_v44, %s646_s26 }
 0xb22   :  { %v287_v45 = vpop.permute.xlu1 %286 }
 0xb23   :  { %v289_v46 = vmul.f32 %v287_v45, %v272_v38 }
 0xb25   :  { %v293_v47 = vpack.c.bf16 %v289_v46, %v289_v46 }
 0xb27   :  { %295 = vrot.lane.b32.xlu2 %v293_v47, %s647_s27 }
 0xb81   :  { %v296_v48 = vpop.permute.xlu2 %295 }
 0xb82   :  { %573 = vmatmul.msk.bf16.vlgmr.msrb.gmra.mxu1 %vm30_vm0, %v296_v48 }
 0xbff   :  { %v309_v50 = vpop.f32.mrf.mxu1 }
 0xc00   :  { %v313_v51 = vadd.f32 %v309_v50, %v292_v49 }
 0xc02   :  { %v314_v52 = vmul.f32 0.5, %v313_v51 }
 0xc04   :  { %v315_v53 = vsel %vm74_vm1, %v313_v51, %v314_v52 }
 0xc05   :  { %627 = vtanh.f32 %v315_v53 }
 0xc07   :  { %v311_v54 = vpop.f32.mrf.mxu1 }
 0xc0b   :  { %v628_v55 = vpop.eup %627 }
 0xc0c   :  { %v317_v56 = vmul.f32 0.5, %v628_v55 }
 0xc0e   :  { %v318_v57 = vadd.f32 0.5, %v317_v56 }
 0xc10   :  { %v319_v58 = vsel %vm74_vm1, %v628_v55, %v318_v57 }
 0xc11   :  { %322 = vrot.lane.b32.xlu0 %v319_v58, %s646_s26  ;;  %v320_v61 = vmul.f32 %v319_v58, %v283_v43 }
 0xc83   :  { %v323_v59 = vpop.permute.xlu0 %322 }
 0xc84   :  { %v325_v60 = vmul.f32 %v323_v59, %v319_v58  ;;  %v601_v59 = vld [vmem:[%s820_s4 + $0x8] sm:$0xff] }
 0xc85   :  { %502 = vmatpush.bf16.msra.mxu0 %v601_v59 }
 0xc86   :  { %327 = vrot.lane.b32.xlu1 %v325_v60, %s646_s26  ;;  %v599_v60 = vld [vmem:[%s821_s3 + $0x8] sm:$0xff] }
 0xc87   :  { %533 = vmatpush.bf16.msra.mxu1 %v599_v60 }
 0xcf8   :  { %v328_v62 = vpop.permute.xlu1 %327 }
 0xcf9   :  { %v330_v63 = vadd.f32 %v328_v62, %v320_v61  ;;  %v600_v61 = vld [vmem:[%s820_s4] sm:$0xff] }
 0xcfa   :  { %v598_v62 = vld [vmem:[%s821_s3] sm:$0xff]  ;;  %503 = vmatpush.bf16.msra.mxu0 %v600_v61 }
 0xcfb   :  { %629 = vtanh.f32 %v330_v63  ;;  %534 = vmatpush.bf16.msra.mxu1 %v598_v62 }
 0xd01   :  { %v630_v0 = vpop.eup %629 }
 0xd02   :  { %333 = vrot.lane.b32.xlu2 %v630_v0, %s646_s26 }
 0xd5c   :  { %v334_v1 = vpop.permute.xlu2 %333 }
 0xd5d   :  { %v336_v2 = vmul.f32 %v334_v1, %v319_v58 }
 0xd5f   :  { %v340_v3 = vpack.c.bf16 %v336_v2, %v336_v2 }
 0xd61   :  { %342 = vrot.lane.b32.xlu0 %v340_v3, %s647_s27 }
 0xdd3   :  { %v343_v4 = vpop.permute.xlu0 %342 }
 0xdd4   :  { %575 = vmatmul.msk.bf16.vlgmr.msrb.gmra.mxu2 %vm30_vm0, %v343_v4  ;;  %v11_v4 = vstv %s822_s5 }
 0xdd5   :  { %12 = vst [vmem:[#allocation4] sm:$0x1] %v11_v4 }
 0xe57   :  { %v356_v7 = vpop.f32.mrf.mxu2 }
 0xe58   :  { %v360_v9 = vadd.f32 %v356_v7, %v339_v6 }
 0xe5a   :  { %v361_v10 = vmul.f32 0.5, %v360_v9 }
 0xe5c   :  { %v362_v11 = vsel %vm74_vm1, %v360_v9, %v361_v10  ;;  %v606_v10 = vld [vmem:[#allocation4] ss:$0 sm:$0xff] }
 0xe5d   :  { %631 = vtanh.f32 %v362_v11 }
 0xe5f   :  { %v358_v12 = vpop.f32.mrf.mxu2 }
 0xe63   :  { %v632_v13 = vpop.eup %631 }
 0xe64   :  { %v364_v14 = vmul.f32 0.5, %v632_v13 }
 0xe66   :  { %v365_v15 = vadd.f32 0.5, %v364_v14 }
 0xe68   :  { %v366_v16 = vsel %vm74_vm1, %v632_v13, %v365_v15 }
 0xe69   :  { %369 = vrot.lane.b32.xlu1 %v366_v16, %s646_s26  ;;  %v367_v19 = vmul.f32 %v366_v16, %v330_v63 }
 0xedb   :  { %v370_v17 = vpop.permute.xlu1 %369 }
 0xedc   :  { %v372_v18 = vmul.f32 %v370_v17, %v366_v16 }
 0xede   :  { %374 = vrot.lane.b32.xlu2 %v372_v18, %s646_s26 }
 0xf38   :  { %v375_v20 = vpop.permute.xlu2 %374 }
 0xf39   :  { %v377_v21 = vadd.f32 %v375_v20, %v367_v19 }
 0xf3b   :  { %633 = vtanh.f32 %v377_v21 }
 0xf3c   :  { %635 = vtanh.f32 %v446_v28 }
 0xf41   :  { %v634_v22 = vpop.eup %633 }
 0xf42   :  { %380 = vrot.lane.b32.xlu0 %v634_v22, %s646_s26  ;;  %v636_v29 = vpop.eup %635 }
 0xf43   :  { %v448_v30 = vmul.f32 0.5, %v636_v29 }
 0xf45   :  { %v449_v31 = vadd.f32 0.5, %v448_v30 }
 0xf47   :  { %v450_v32 = vsel %vm74_vm1, %v636_v29, %v449_v31 }
 0xf48   :  { %v451_v49 = vmul.f32 0.0, %v450_v32 }
 0xf4a   :  { %453 = vrot.lane.b32.xlu0 %v450_v32, %s646_s26 }
 0xfb4   :  { %v381_v23 = vpop.permute.xlu0 %380 }
 0xfb5   :  { %v383_v24 = vmul.f32 %v381_v23, %v366_v16 }
 0xfb7   :  { %v387_v25 = vpack.c.bf16 %v383_v24, %v383_v24 }
 0xfb9   :  { %389 = vrot.lane.b32.xlu1 %v387_v25, %s647_s27 }
 0xfbc   :  { %v454_v45 = vpop.permute.xlu0 %453 }
 0xfbd   :  { %v456_v46 = vmul.f32 %v454_v45, %v450_v32 }
0x102b   :  { %v390_v33 = vpop.permute.xlu1 %389 }
0x102c   :  { %577 = vmatmul.msk.bf16.vlgmr.msrb.gmra.mxu3 %vm30_vm0, %v390_v33 }
0x10af   :  { %v403_v36 = vpop.f32.mrf.mxu3 }
0x10b0   :  { %v407_v37 = vadd.f32 %v403_v36, %v386_v35 }
0x10b2   :  { %v408_v38 = vmul.f32 0.5, %v407_v37 }
0x10b4   :  { %v409_v39 = vsel %vm74_vm1, %v407_v37, %v408_v38 }
0x10b5   :  { %637 = vtanh.f32 %v409_v39 }
0x10b7   :  { %v405_v40 = vpop.f32.mrf.mxu3 }
0x10bb   :  { %v638_v41 = vpop.eup %637 }
0x10bc   :  { %v411_v42 = vmul.f32 0.5, %v638_v41 }
0x10be   :  { %v412_v43 = vadd.f32 0.5, %v411_v42 }
0x10c0   :  { %v413_v44 = vsel %vm74_vm1, %v638_v41, %v412_v43 }
0x10c1   :  { %416 = vrot.lane.b32.xlu2 %v413_v44, %s646_s26  ;;  %v414_v53 = vmul.f32 %v413_v44, %v377_v21 }
0x10c9   :  { %458 = vrot.lane.b32.xlu2 %v456_v46, %s646_s26 }
0x111b   :  { %v417_v47 = vpop.permute.xlu2 %416 }
0x111c   :  { %v419_v48 = vmul.f32 %v417_v47, %v413_v44 }
0x111e   :  { %421 = vrot.lane.b32.xlu1 %v419_v48, %s646_s26 }
0x1123   :  { %v459_v50 = vpop.permute.xlu2 %458 }
0x1124   :  { %v461_v51 = vadd.f32 %v459_v50, %v451_v49 }
0x1126   :  { %639 = vtanh.f32 %v461_v51 }
0x112c   :  { %v640_v52 = vpop.eup %639 }
0x112d   :  { %464 = vrot.lane.b32.xlu1 %v640_v52, %s646_s26 }
0x1190   :  { %v422_v8 = vpop.permute.xlu1 %421 }
0x1191   :  { %v424_v54 = vadd.f32 %v422_v8, %v414_v53 }
0x1193   :  { %641 = vtanh.f32 %v424_v54 }
0x1199   :  { %v642_v55 = vpop.eup %641 }
0x119a   :  { %427 = vrot.lane.b32.xlu0 %v642_v55, %s646_s26 }
0x119f   :  { %v465_v56 = vpop.permute.xlu1 %464 }
0x11a0   :  { %v467_v57 = vmul.f32 %v465_v56, %v450_v32 }
0x11a2   :  { %v473_v58 = vpack.c.bf16 %v467_v57, %v467_v57 }
0x11a4   :  { %479 = vrot.lane.b32.xlu2 %v473_v58, %s647_s27 }
0x11ac   :  { %437 = vrot.lane.b32.xlu2 %v424_v54, %s648_s0 }
0x11fe   :  { %v480_v63 = vpop.permute.xlu2 %479 }
0x11ff   :  { %586 = vmatmul.msk.bf16.vlgmr.msra.gmra.mxu0 %vm30_vm0, %v480_v63 }
0x1206   :  { %v438_v0 = vpop.permute.xlu2 %437 }
0x1207   :  { %440 = vst.msk [vmem:[#allocation3] sm:$0xff] %vm30_vm0, %v438_v0 }
0x120c   :  { %v428_v1 = vpop.permute.xlu0 %427 }
0x120d   :  { %v430_v2 = vmul.f32 %v428_v1, %v413_v44 }
0x120f   :  { %v468_v3 = vpack.c.bf16 %v430_v2, %v430_v2  ;;  %432 = vrot.lane.b32.xlu1 %v430_v2, %s647_s27 }
0x1211   :  { %510 = vrot.lane.b32.xlu0 %v468_v3, %s647_s27 }
0x127c   :  { %v505_v5 = vpop.f32.mrf.mxu0 }
0x1281   :  { %v433_v6 = vpop.permute.xlu1 %432 }
0x1282   :  { %435 = vst.msk [vmem:[#allocation2] sm:$0xff] %vm30_vm0, %v433_v6 }
0x1283   :  { %v511_v7 = vpop.permute.xlu0 %510 }
0x1284   :  { %595 = vmatmul.msk.bf16.vlgmr.msra.gmra.mxu1 %vm30_vm0, %v511_v7  ;;  %v507_v9 = vpop.f32.mrf.mxu0 }
0x1301   :  { %v536_v11 = vpop.f32.mrf.mxu1 }
0x1302   :  { %v537_v12 = vadd.f32 %v536_v11, %v505_v5 }
0x1304   :  { %v544_v13 = vadd.f32 %v606_v10, %v537_v12 }
0x1306   :  { %v545_v14 = vmul.f32 0.5, %v544_v13 }
0x1308   :  { %643 = vtanh.f32 %v545_v14 }
0x1309   :  { %v538_v15 = vpop.f32.mrf.mxu1 }
0x130e   :  { %v644_v16 = vpop.eup %643 }
0x130f   :  { %v547_v17 = vmul.f32 0.5, %v644_v16 }
0x1311   :  { %v548_v18 = vadd.f32 0.5, %v547_v17 }
0x1313   :  { %550 = vst.msk [vmem:[%s823_s6] sm:$0xff] %vm549_vm2, %v548_v18 }

</bundles_post_ra>
